<compile_context>
chip_gen: v6e
topology: v6e:2x2x1
jax: 0.10.0
libtpu: 0.0.40
codegen_flags: <defaults>
</compile_context>

<pallas_src>
import functools

import jax
import jax.numpy as jnp
from jax.experimental import pallas as pl
from jax.experimental.pallas import tpu as pltpu


def _soft_ce_kernel(pred_ref, tgt_ref, out_ref, acc_ref, *,
                    hw, tile_t, n_samples, tile_b, mask_hw, mask_b):
    """One (batch-block, spatial-tile) step: accumulate per-position soft CE."""
    j = pl.program_id(1)

    @pl.when(j == 0)
    def _():
        acc_ref[...] = jnp.zeros_like(acc_ref)

    x = pred_ref[...].astype(jnp.float32)   # (B, C, T) classes on sublanes
    t = tgt_ref[...].astype(jnp.float32)    # (B, C, T)

    # Numerically stable log-sum-exp over the class (sublane) axis, per sample.
    m = jnp.max(x, axis=1, keepdims=True)                                # (B, 1, T)
    lse = m + jnp.log(jnp.sum(jnp.exp(x - m), axis=1, keepdims=True))    # (B, 1, T)

    # per-position loss = sum_c t*(lse - x) = lse*sum_c(t) - sum_c(t*x)
    pos_loss = (lse * jnp.sum(t, axis=1, keepdims=True)
                - jnp.sum(t * x, axis=1, keepdims=True))                 # (B, 1, T)

    # Ragged-tile masks — trace-time gated so fully-tiled configs pay nothing.
    if mask_hw:
        col = jax.lax.broadcasted_iota(jnp.int32, pos_loss.shape, 2)
        pos_loss = jnp.where(col < (hw - j * tile_t), pos_loss, 0.0)
    if mask_b:
        b = pl.program_id(0)
        row = jax.lax.broadcasted_iota(jnp.int32, pos_loss.shape, 0)
        pos_loss = jnp.where(row < (n_samples - b * tile_b), pos_loss, 0.0)

    # Lane-wide running sum; cross-lane reduce deferred to the last tile.
    acc_ref[...] += jnp.sum(pos_loss, axis=0)                            # (1, T)

    @pl.when(j == pl.num_programs(1) - 1)
    def _():
        out_ref[...] = jnp.sum(acc_ref[...], keepdims=True)              # (1, 1)


class SoftCrossEntropy:
    """Cross entropy that accepts soft targets (Pallas TPU implementation)."""

    NUM_CLASSES = 14
    # ~1 MiB per input block in f32 (16-sublane-padded C x 16384 lanes):
    # ~4-5 MiB with double-buffering — comfortably inside v5e's 16 MiB scoped
    # VMEM default and far below v6e/v7x limits.
    MAX_TILE = 16384

    def __init__(self):
        # Deterministic weight init, mirroring the PyTorch __init__.
        # NOTE: `weights` is never used in forward() of the reference module.
        w = jnp.full((self.NUM_CLASSES,), 0.99 / 13, dtype=jnp.float32)
        self.weights = w.at[0].set(0.01)

    def __call__(self, raw_pred, ref_labels):
        return self.forward(raw_pred, ref_labels)

    def forward(self, raw_pred, ref_labels):
        assert raw_pred.shape == ref_labels.shape
        if raw_pred.ndim == 2:
            # (N, C): classes -> sublanes, batch -> lanes.
            # TODO(synk): avoid this HBM transpose (tile N on sublanes) if the
            # 2-D path ever becomes hot.
            x3 = jnp.transpose(raw_pred)[None]
            t3 = jnp.transpose(ref_labels)[None]
        else:
            # (N, C, ...): free reshape, no transpose — class axis is already
            # second-to-last once the trailing spatial dims are flattened.
            N0, C0 = raw_pred.shape[:2]
            x3 = raw_pred.reshape(N0, C0, -1)
            t3 = ref_labels.reshape(N0, C0, -1)

        N, C, HW = x3.shape
        total_positions = N * HW  # mean over sum(dim=1) == mean over N*H*W

        if HW >= self.MAX_TILE:
            # Large spatial axis: 128-aligned lane tiles; ragged tail masked.
            T = self.MAX_TILE
            B = 1
        else:
            # Small spatial axis: whole extent per block, pack samples so each
            # grid step moves a large slab (amortizes per-step overhead/DMA).
            T = HW
            B = min(N, max(1, self.MAX_TILE // HW))

        n_t = int(pl.cdiv(HW, T))
        n_b = int(pl.cdiv(N, B))

        kernel = functools.partial(
            _soft_ce_kernel,
            hw=int(HW), tile_t=int(T),
            n_samples=int(N), tile_b=int(B),
            mask_hw=(HW % T != 0),
            mask_b=(N % B != 0),
        )

        partials = pl.pallas_call(
            kernel,
            out_shape=jax.ShapeDtypeStruct((n_b, 1), jnp.float32),
            grid_spec=pltpu.PrefetchScalarGridSpec(
                num_scalar_prefetch=0,
                grid=(n_b, n_t),
                in_specs=[
                    pl.BlockSpec((B, C, T), lambda b, j: (b, 0, j)),
                    pl.BlockSpec((B, C, T), lambda b, j: (b, 0, j)),
                ],
                out_specs=pl.BlockSpec((1, 1), lambda b, j: (b, 0)),
                scratch_shapes=[pltpu.VMEM((1, T), jnp.float32)],
            ),
            compiler_params=pltpu.CompilerParams(
                # Batch-block axis carries no state across steps -> parallel
                # (megacore sharding on v7x); spatial axis is the reduction.
                dimension_semantics=("parallel", "arbitrary"),
            ),
        )(x3, t3)

        # Tiny final reduction + mean scaling in plain JAX.
        return jnp.sum(partials) / jnp.float32(total_positions)


def _reference(raw_pred, ref_labels):
    x = raw_pred.astype(jnp.float32)
    log_prob = jax.nn.log_softmax(x, axis=1)
    res = -(ref_labels.astype(jnp.float32) * log_prob)
    return jnp.mean(jnp.sum(res, axis=1))


if __name__ == "__main__":
    key = jax.random.PRNGKey(0)
    k1, k2 = jax.random.split(key)

    N, C, H, W = 2, 14, 16, 16
    raw_pred = jax.random.normal(k1, (N, C, H, W), dtype=jnp.float32)
    # Soft targets: normalized over the class axis.
    logits_t = jax.random.normal(k2, (N, C, H, W), dtype=jnp.float32)
    ref_labels = jax.nn.softmax(logits_t, axis=1)

    loss_fn = SoftCrossEntropy()
    out = jax.block_until_ready(loss_fn(raw_pred, ref_labels))

    ref = jax.block_until_ready(_reference(raw_pred, ref_labels))
    assert jnp.allclose(out, ref, rtol=1e-5, atol=1e-5), (out, ref)

    print("KERNEL_OK")
</pallas_src>

<mosaic_0001>
module attributes {stable_mosaic.version = 11 : i64} {
  func.func @_soft_ce_kernel(%arg0: i32, %arg1: i32, %arg2: memref<2x14x256xf32, #tpu.memory_space<vmem>>, %arg3: memref<2x14x256xf32, #tpu.memory_space<vmem>>, %arg4: memref<1x1xf32, #tpu.memory_space<vmem>>, %arg5: memref<1x256xf32, #tpu.memory_space<vmem>>) attributes {dimension_semantics = [#tpu.dimension_semantics<parallel>, #tpu.dimension_semantics<arbitrary>], iteration_bounds = array<i64: 1, 1>, scalar_prefetch = 0 : i64, scratch_operands = 1 : i64, tpu.core_type = #tpu.core_type<tc>, window_params = [{transform_indices = @transform_0, window_bounds = array<i64: 2, 14, 256>}, {transform_indices = @transform_1, window_bounds = array<i64: 2, 14, 256>}, {transform_indices = @transform_2, window_bounds = array<i64: 1, 1>}]} {
    %c0_i32 = arith.constant 0 : i32
    %0 = arith.cmpi eq, %arg1, %c0_i32 : i32
    %1 = arith.extui %0 : i1 to i32
    %c0_i32_0 = arith.constant 0 : i32
    %2 = arith.cmpi ne, %1, %c0_i32_0 : i32
    scf.if %2 {
      %cst_16 = arith.constant 0.000000e+00 : f32
      %28 = vector.broadcast %cst_16 : f32 to vector<1x256xf32>
      %c0_17 = arith.constant 0 : index
      %c0_18 = arith.constant 0 : index
      %29 = vector.load %arg5[%c0_17, %c0_18] : memref<1x256xf32, #tpu.memory_space<vmem>>, vector<1x256xf32>
      tpu.vector_store %arg5[%c0_17, %c0_18], %28 {strides = array<i32>} : memref<1x256xf32, #tpu.memory_space<vmem>>, vector<1x256xf32>,
    } else {
    }
    %c0 = arith.constant 0 : index
    %c0_1 = arith.constant 0 : index
    %c0_2 = arith.constant 0 : index
    %3 = vector.load %arg2[%c0, %c0_1, %c0_2] : memref<2x14x256xf32, #tpu.memory_space<vmem>>, vector<2x14x256xf32>
    %c0_3 = arith.constant 0 : index
    %c0_4 = arith.constant 0 : index
    %c0_5 = arith.constant 0 : index
    %4 = vector.load %arg3[%c0_3, %c0_4, %c0_5] : memref<2x14x256xf32, #tpu.memory_space<vmem>>, vector<2x14x256xf32>
    %cst = arith.constant dense<0xFF800000> : vector<2x256xf32>
    %5 = vector.multi_reduction <maximumf>, %3, %cst [1] : vector<2x14x256xf32> to vector<2x256xf32>
    %6 = vector.shape_cast %5 : vector<2x256xf32> to vector<2x1x256xf32>
    %7 = vector.broadcast %6 : vector<2x1x256xf32> to vector<2x14x256xf32>
    %8 = arith.subf %3, %7 : vector<2x14x256xf32>
    %9 = math.exp %8 : vector<2x14x256xf32>
    %cst_6 = arith.constant dense<0.000000e+00> : vector<2x256xf32>
    %10 = vector.multi_reduction <add>, %9, %cst_6 [1] : vector<2x14x256xf32> to vector<2x256xf32>
    %11 = vector.shape_cast %10 : vector<2x256xf32> to vector<2x1x256xf32>
    %12 = math.log %11 : vector<2x1x256xf32>
    %13 = arith.addf %6, %12 : vector<2x1x256xf32>
    %cst_7 = arith.constant dense<0.000000e+00> : vector<2x256xf32>
    %14 = vector.multi_reduction <add>, %4, %cst_7 [1] : vector<2x14x256xf32> to vector<2x256xf32>
    %15 = vector.shape_cast %14 : vector<2x256xf32> to vector<2x1x256xf32>
    %16 = arith.mulf %13, %15 : vector<2x1x256xf32>
    %17 = arith.mulf %4, %3 : vector<2x14x256xf32>
    %cst_8 = arith.constant dense<0.000000e+00> : vector<2x256xf32>
    %18 = vector.multi_reduction <add>, %17, %cst_8 [1] : vector<2x14x256xf32> to vector<2x256xf32>
    %19 = vector.shape_cast %18 : vector<2x256xf32> to vector<2x1x256xf32>
    %20 = arith.subf %16, %19 : vector<2x1x256xf32>
    %c0_9 = arith.constant 0 : index
    %c0_10 = arith.constant 0 : index
    %21 = vector.load %arg5[%c0_9, %c0_10] : memref<1x256xf32, #tpu.memory_space<vmem>>, vector<1x256xf32>
    %cst_11 = arith.constant dense<0.000000e+00> : vector<1x256xf32>
    %22 = vector.multi_reduction <add>, %20, %cst_11 [0] : vector<2x1x256xf32> to vector<1x256xf32>
    %23 = arith.addf %21, %22 : vector<1x256xf32>
    %c0_12 = arith.constant 0 : index
    %c0_13 = arith.constant 0 : index
    %24 = vector.load %arg5[%c0_12, %c0_13] : memref<1x256xf32, #tpu.memory_space<vmem>>, vector<1x256xf32>
    tpu.vector_store %arg5[%c0_12, %c0_13], %23 {strides = array<i32>} : memref<1x256xf32, #tpu.memory_space<vmem>>, vector<1x256xf32>,
    %c0_i32_14 = arith.constant 0 : i32
    %25 = arith.cmpi eq, %arg1, %c0_i32_14 : i32
    %26 = arith.extui %25 : i1 to i32
    %c0_i32_15 = arith.constant 0 : i32
    %27 = arith.cmpi ne, %26, %c0_i32_15 : i32
    scf.if %27 {
      %c0_16 = arith.constant 0 : index
      %c0_17 = arith.constant 0 : index
      %28 = vector.load %arg5[%c0_16, %c0_17] : memref<1x256xf32, #tpu.memory_space<vmem>>, vector<1x256xf32>
      %29 = vector.shape_cast %28 : vector<1x256xf32> to vector<1x1x256xf32>
      %cst_18 = arith.constant dense<0.000000e+00> : vector<1xf32>
      %30 = vector.multi_reduction <add>, %29, %cst_18 [1, 2] : vector<1x1x256xf32> to vector<1xf32>
      %31 = vector.shape_cast %30 : vector<1xf32> to vector<1x1x1xf32>
      %32 = vector.extract %31[0, 0, 0] : f32 from vector<1x1x1xf32>
      %33 = vector.broadcast %32 : f32 to vector<1x1xf32>
      %c0_19 = arith.constant 0 : index
      %c0_20 = arith.constant 0 : index
      %34 = vector.load %arg4[%c0_19, %c0_20] : memref<1x1xf32, #tpu.memory_space<vmem>>, vector<1x1xf32>
      tpu.vector_store %arg4[%c0_19, %c0_20], %33 {strides = array<i32>} : memref<1x1xf32, #tpu.memory_space<vmem>>, vector<1x1xf32>,
    } else {
    }
    return
  }
  func.func @transform_0(%arg0: i32, %arg1: i32) -> (i32, i32, i32) {
    %c0_i32 = arith.constant 0 : i32
    %c0_i32_0 = arith.constant 0 : i32
    return %arg0, %c0_i32, %arg1 : i32, i32, i32
  }
  func.func @transform_1(%arg0: i32, %arg1: i32) -> (i32, i32, i32) {
    %c0_i32 = arith.constant 0 : i32
    %c0_i32_0 = arith.constant 0 : i32
    return %arg0, %c0_i32, %arg1 : i32, i32, i32
  }
  func.func @transform_2(%arg0: i32, %arg1: i32) -> (i32, i32) {
    %c0_i32 = arith.constant 0 : i32
    %c0_i32_0 = arith.constant 0 : i32
    return %arg0, %c0_i32 : i32, i32
  }
}

</mosaic_0001>

<bundles_post_ra>
// kernel: tpu_custom_call.1
= control target key start
LH: loop header
LB: loop body
LE: loop exit
PB: predicated region body
PF: predicated region fallthrough
CT: control target
= control target key end

     0   :  { %v16_v0 = vlaneseq  ;;  %vm37_vm0 = vcmask 1045504   ;;  %v341_v11 = vmov 0.0   ;;  %s496_s0 = inlined_call_operand.vmem [shape: f32[2,14,256], index: 0, kind: input, shape index: {}]   ;;  %s497_s1 = inlined_call_operand.vmem [shape: f32[2,14,256], index: 1, kind: input, shape index: {}]   ;;  %s498_s2 = inlined_call_operand.hbm [shape: f32[1,1], index: 2, kind: output, shape index: {}]  }
   0x1   :  { %v362_v1 = vld [vmem:[%s496_s0] sm:$0xff]  ;;  %v367_v2 = vld [vmem:[%s496_s0 + $0x10] sm:$0x3f]  ;;  %v372_v3 = vld [vmem:[%s496_s0 + $0x8] sm:$0xff] }
   0x2   :  { %v377_v4 = vld [vmem:[%s496_s0 + $0x18] sm:$0x3f]  ;;  %v38_v5 = vsel %vm37_vm0, %v367_v2, -inf  ;;  %vm382_vm1 = vcmp.lt.s32.totalorder %v16_v0, 256  ;;  %v389_v7 = vld [vmem:[%s496_s0 + $0x20] sm:$0xff]  ;;  %v407_v12 = vld [vmem:[%s496_s0 + $0x28] sm:$0xff] }
   0x3   :  { %v394_v8 = vld [vmem:[%s496_s0 + $0x30] sm:$0x3f]  ;;  %v399_v9 = vld [vmem:[%s496_s0 + $0x38] sm:$0x3f]  ;;  %v39_v10 = vmax.f32 %v362_v1, %v38_v5  ;;  %20 = vst.msk [vmem:[#allocation2] sm:$0x3] %vm382_vm1, %v341_v11 }
   0x4   :  { %v46_v13 = vsel %vm37_vm0, %v377_v4, -inf  ;;  %v54_v16 = vsel %vm37_vm0, %v394_v8, -inf  ;;  %v62_v18 = vsel %vm37_vm0, %v399_v9, -inf }
   0x5   :  { %v40_v14 = vrot.slane %v39_v10, 4  ;;  %v47_v15 = vmax.f32 %v372_v3, %v46_v13  ;;  %v55_v17 = vmax.f32 %v389_v7, %v54_v16  ;;  %v63_v21 = vmax.f32 %v407_v12, %v62_v18 }
   0x7   :  { %v41_v19 = vmax.f32 %v39_v10, %v40_v14  ;;  %v48_v20 = vrot.slane %v47_v15, 4 }
   0x8   :  { %7 = vsyncpa [#allocation4], 0  ;;  %v56_v22 = vrot.slane %v55_v17, 4  ;;  %v64_v25 = vrot.slane %v63_v21, 4  ;;  %v31_v59 = vld [vmem:[%s497_s1 + $0x10] sm:$0x3f] }
   0x9   :  { %v42_v23 = vrot.slane %v41_v19, 2  ;;  %v49_v24 = vmax.f32 %v47_v15, %v48_v20  ;;  %v32_v60 = vld [vmem:[%s497_s1 + $0x18] sm:$0x3f]  ;;  %v29_v61 = vld [vmem:[%s497_s1] sm:$0xff]  ;;  %v30_v62 = vld [vmem:[%s497_s1 + $0x8] sm:$0xff]  ;;  %v138_v63 = vsel %vm37_vm0, %v31_v59, 0.0 }
   0xa   :  { %v57_v26 = vmax.f32 %v55_v17, %v56_v22  ;;  %v65_v29 = vmax.f32 %v63_v21, %v64_v25  ;;  %v146_v5 = vsel %vm37_vm0, %v32_v60, 0.0  ;;  %v35_v14 = vld [vmem:[%s497_s1 + $0x30] sm:$0x3f]  ;;  %v139_v16 = vadd.f32 %v138_v63, %v29_v61 }
   0xb   :  { %v43_v27 = vmax.f32 %v41_v19, %v42_v23  ;;  %v50_v28 = vrot.slane %v49_v24, 2  ;;  %v147_v17 = vadd.f32 %v146_v5, %v30_v62  ;;  %v36_v19 = vld [vmem:[%s497_s1 + $0x38] sm:$0x3f]  ;;  %v174_v23 = vmul.f32 %v29_v61, %v362_v1 }
   0xc   :  { %v58_v30 = vrot.slane %v57_v26, 2  ;;  %v66_v33 = vrot.slane %v65_v29, 2  ;;  %vm260_vm2 = vcmask 1040384   ;;  %vm274_vm3 = vcmask 0  }
   0xd   :  { %v44_v31 = vrot.slane %v43_v27, 1  ;;  %v51_v32 = vmax.f32 %v49_v24, %v50_v28  ;;  %v175_v24 = vmul.f32 %v30_v62, %v372_v3 }
   0xe   :  { %v59_v34 = vmax.f32 %v57_v26, %v58_v30  ;;  %v67_v37 = vmax.f32 %v65_v29, %v66_v33  ;;  %v33_v26 = vld [vmem:[%s497_s1 + $0x20] sm:$0xff]  ;;  %v154_v29 = vsel %vm37_vm0, %v35_v14, 0.0  ;;  %v176_v30 = vmul.f32 %v31_v59, %v367_v2 }
   0xf   :  { %v418_v35 = vmax.f32 %v43_v27, %v44_v31  ;;  %v52_v36 = vrot.slane %v51_v32, 1  ;;  %v148_v33 = vrot.slane %v147_v17, 4 }
  0x10   :  { %v60_v38 = vrot.slane %v59_v34, 1  ;;  %v68_v40 = vrot.slane %v67_v37, 1 }
  0x11   :  { %v420_v39 = vmax.f32 %v51_v32, %v52_v36  ;;  %v70_v41 = vsub.f32 %v362_v1, %v418_v35  ;;  %v72_v42 = vsub.f32 %v367_v2, %v418_v35  ;;  %v140_v32 = vrot.slane %v139_v16, 4 }
  0x12   :  { %v426_v43 = vmax.f32 %v59_v34, %v60_v38  ;;  %v428_v44 = vmax.f32 %v67_v37, %v68_v40  ;;  %v162_v34 = vsel %vm37_vm0, %v36_v19, 0.0  ;;  %v177_v1 = vmul.f32 %v32_v60, %v377_v4 }
  0x13   :  { %v71_v45 = vsub.f32 %v372_v3, %v420_v39  ;;  %v73_v46 = vsub.f32 %v377_v4, %v420_v39  ;;  %v78_v47 = vmul.f32 1.442695, %v70_v41  ;;  %v82_v50 = vmul.f32 1.442695, %v72_v42  ;;  %v34_v3 = vld [vmem:[%s497_s1 + $0x28] sm:$0xff]  ;;  %s343_s1 = smov [#allocation3]  }
  0x14   :  { %v74_v48 = vsub.f32 %v389_v7, %v426_v43  ;;  %v76_v49 = vsub.f32 %v394_v8, %v426_v43  ;;  %v75_v51 = vsub.f32 %v407_v12, %v428_v44  ;;  %v77_v52 = vsub.f32 %v399_v9, %v428_v44  ;;  %s282_s12 = sshll.u32 %s343_s1, 4  ;;  %s283_s12 = int_to_ptr.vmem [resolvable:$true] %s282_s12 }
  0x15   :  { %295 = vpow2.f32 %v78_v47  ;;  %v80_v53 = vmul.f32 1.442695, %v71_v45  ;;  %v84_v54 = vmul.f32 1.442695, %v73_v46  ;;  %v180_v41 = vmul.f32 %v35_v14, %v394_v8  ;;  %s319_s14 = scalar_lea.vmem %s283_s12, 16  ;;  %s323_s15 = scalar_lea.vmem %s283_s12, 32 }
  0x16   :  { %297 = vpow2.f32 %v82_v50  ;;  %v86_v55 = vmul.f32 1.442695, %v74_v48  ;;  %v88_v56 = vmul.f32 1.442695, %v75_v51  ;;  %v90_v57 = vmul.f32 1.442695, %v76_v49  ;;  %p320_p0 = scmp.ne.s32.totalorder %s283_s12, %s319_s14  ;;  %p324_p1 = scmp.lt.s32.totalorder %s283_s12, %s283_s12 }
  0x17   :  { %299 = vpow2.f32 %v80_v53  ;;  %v92_v58 = vmul.f32 1.442695, %v77_v52  ;;  %v155_v45 = vadd.f32 %v154_v29, %v33_v26  ;;  %v181_v46 = vmul.f32 %v36_v19, %v399_v9  ;;  %p325_p2 = scmp.lt.s32.totalorder %s323_s15, %s319_s14 }
  0x18   :  { %301 = vpow2.f32 %v84_v54  ;;  %v182_v49 = vsel %vm37_vm0, %v176_v30, 0.0  ;;  %v178_v51 = vmul.f32 %v33_v26, %v389_v7  ;;  %v179_v52 = vmul.f32 %v34_v3, %v407_v12 }
  0x19   :  { %303 = vpow2.f32 %v86_v55  ;;  %v190_v53 = vsel %vm37_vm0, %v177_v1, 0.0  ;;  %v183_v9 = vadd.f32 %v182_v49, %v174_v23  ;;  %v206_v59 = vsel %vm37_vm0, %v181_v46, 0.0  ;;  %p326_p3 = por %p325_p2, %p324_p1 }
  0x1a   :  { %305 = vpow2.f32 %v88_v56  ;;  %v198_v56 = vsel %vm37_vm0, %v180_v41, 0.0  ;;  %v191_v63 = vadd.f32 %v190_v53, %v175_v24  ;;  %v141_v7 = vadd.f32 %v140_v32, %v139_v16 }
  0x1b   :  { %307 = vpow2.f32 %v90_v57  ;;  %v199_v12 = vadd.f32 %v198_v56, %v178_v51  ;;  %v149_v19 = vadd.f32 %v148_v33, %v147_v17  ;;  %p327_p4 = pnand %p326_p3, %p320_p0 }
  0x1c   :  { %309 = vpow2.f32 %v92_v58  ;;  %v163_v58 = vadd.f32 %v162_v34, %v34_v3  ;;  %v142_v30 = vrot.slane %v141_v7, 2 }
  0x1d   :  { %v150_v1 = vrot.slane %v149_v19, 2 }
  0x1f   :  { %v151_v41 = vadd.f32 %v150_v1, %v149_v19 }
  0x21   :  { %v152_v49 = vrot.slane %v151_v41, 1 }
  0x22   :  { %v296_v10 = vpop.eup %295 }
  0x23   :  { %v298_v11 = vpop.eup %297 }
  0x24   :  { %v300_v13 = vpop.eup %299  ;;  %v94_v15 = vsel %vm37_vm0, %v298_v11, 0.0 }
  0x25   :  { %v302_v18 = vpop.eup %301  ;;  %v95_v20 = vadd.f32 %v296_v10, %v94_v15  ;;  %v156_v10 = vrot.slane %v155_v45, 4  ;;  %v207_v15 = vadd.f32 %v206_v59, %v179_v52 }
  0x26   :  { %v304_v21 = vpop.eup %303  ;;  %v102_v22 = vsel %vm37_vm0, %v302_v18, 0.0 }
  0x27   :  { %v306_v25 = vpop.eup %305  ;;  %v96_v27 = vrot.slane %v95_v20, 4  ;;  %v103_v28 = vadd.f32 %v300_v13, %v102_v22  ;;  %v157_v24 = vadd.f32 %v156_v10, %v155_v45  ;;  %v208_v16 = vrot.slane %v207_v15, 4 }
  0x28   :  { %v308_v31 = vpop.eup %307 }
  0x29   :  { %v310_v36 = vpop.eup %309  ;;  %v97_v37 = vadd.f32 %v96_v27, %v95_v20  ;;  %v104_v38 = vrot.slane %v103_v28, 4  ;;  %v110_v40 = vsel %vm37_vm0, %v308_v31, 0.0  ;;  %v164_v20 = vrot.slane %v163_v58, 4 }
  0x2a   :  { %v111_v42 = vadd.f32 %v304_v21, %v110_v40  ;;  %v118_v2 = vsel %vm37_vm0, %v310_v36, 0.0  ;;  %v184_v21 = vrot.slane %v183_v9, 4  ;;  %v200_v27 = vrot.slane %v199_v12, 4 }
  0x2b   :  { %v98_v47 = vrot.slane %v97_v37, 2  ;;  %v105_v48 = vadd.f32 %v104_v38, %v103_v28  ;;  %v119_v4 = vadd.f32 %v306_v25, %v118_v2  ;;  %v192_v25 = vrot.slane %v191_v63, 4 }
  0x2c   :  { %v112_v50 = vrot.slane %v111_v42, 4  ;;  %v165_v31 = vadd.f32 %v164_v20, %v163_v58  ;;  %v185_v32 = vadd.f32 %v184_v21, %v183_v9  ;;  %v201_v17 = vadd.f32 %v200_v27, %v199_v12 }
  0x2d   :  { %v99_v54 = vadd.f32 %v98_v47, %v97_v37  ;;  %v106_v8 = vrot.slane %v105_v48, 2  ;;  %v120_v55 = vrot.slane %v119_v4, 4  ;;  %v193_v36 = vadd.f32 %v192_v25, %v191_v63 }
  0x2e   :  { %v113_v57 = vadd.f32 %v112_v50, %v111_v42  ;;  %v158_v33 = vrot.slane %v157_v24, 2  ;;  %v209_v3 = vadd.f32 %v208_v16, %v207_v15  ;;  %v143_v37 = vadd.f32 %v142_v30, %v141_v7 }
  0x2f   :  { %v100_v60 = vrot.slane %v99_v54, 1  ;;  %v107_v61 = vadd.f32 %v106_v8, %v105_v48  ;;  %v121_v62 = vadd.f32 %v120_v55, %v119_v4  ;;  %v166_v38 = vrot.slane %v165_v31, 2 }
  0x30   :  { %v114_v5 = vrot.slane %v113_v57, 2  ;;  %v186_v40 = vrot.slane %v185_v32, 2  ;;  %v194_v42 = vrot.slane %v193_v36, 2  ;;  %v202_v2 = vrot.slane %v201_v17, 2 }
  0x31   :  { %v101_v11 = vadd.f32 %v100_v60, %v99_v54  ;;  %v108_v13 = vrot.slane %v107_v61, 1  ;;  %v122_v14 = vrot.slane %v121_v62, 2  ;;  %v159_v45 = vadd.f32 %v158_v33, %v157_v24  ;;  %v218_v33 = vld [vmem:[#allocation2] sm:$0x3] }
  0x32   :  { %v115_v18 = vadd.f32 %v114_v5, %v113_v57  ;;  %v210_v46 = vrot.slane %v209_v3, 2  ;;  %v144_v47 = vrot.slane %v143_v37, 1  ;;  %v167_v48 = vadd.f32 %v166_v38, %v165_v31 }
  0x33   :  { %v109_v22 = vadd.f32 %v108_v13, %v107_v61  ;;  %v123_v23 = vadd.f32 %v122_v14, %v121_v62  ;;  %311 = vlog2.f32 %v101_v11  ;;  %v187_v4 = vadd.f32 %v186_v40, %v185_v32 }
  0x34   :  { %v116_v26 = vrot.slane %v115_v18, 1  ;;  %v195_v50 = vadd.f32 %v194_v42, %v193_v36  ;;  %v203_v52 = vadd.f32 %v202_v2, %v201_v17  ;;  %v160_v54 = vrot.slane %v159_v45, 1 }
  0x35   :  { %v124_v28 = vrot.slane %v123_v23, 1  ;;  %313 = vlog2.f32 %v109_v22  ;;  %v211_v8 = vadd.f32 %v210_v46, %v209_v3  ;;  %v145_v56 = vadd.f32 %v144_v47, %v143_v37 }
  0x36   :  { %v117_v29 = vadd.f32 %v116_v26, %v115_v18  ;;  %v168_v57 = vrot.slane %v167_v48, 1  ;;  %v188_v58 = vrot.slane %v187_v4, 1  ;;  %v153_v60 = vadd.f32 %v152_v49, %v151_v41 }
  0x37   :  { %v125_v34 = vadd.f32 %v124_v28, %v123_v23  ;;  %v196_v61 = vrot.slane %v195_v50, 1  ;;  %v204_v62 = vrot.slane %v203_v52, 1  ;;  %v161_v7 = vadd.f32 %v160_v54, %v159_v45 }
  0x38   :  { %315 = vlog2.f32 %v117_v29  ;;  %v212_v10 = vrot.slane %v211_v8, 1  ;;  %v169_v13 = vadd.f32 %v168_v57, %v167_v48  ;;  %v189_v15 = vadd.f32 %v188_v58, %v187_v4 }
  0x39   :  { %317 = vlog2.f32 %v125_v34  ;;  %v197_v20 = vadd.f32 %v196_v61, %v195_v50  ;;  %v342_v21 = vmov 1966171168   ;;  %v205_v23 = vadd.f32 %v204_v62, %v203_v52 }
  0x3a   :  { %v225_v22 = vunpack.c.l.s4 %v342_v21  ;;  %v213_v26 = vadd.f32 %v212_v10, %v211_v8  ;;  %v228_v29 = vshrl.u32 %v16_v0, 7 }
  0x3c   :  { %v226_v16 = vunpack.c.0.s8 %v225_v22  ;;  %v256_v37 = vsub.s32 1, %v228_v29 }
  0x3e   :  { %v229_v1 = vsub.s32 %v226_v16, %v228_v29 }
  0x40   :  { %v312_v51 = vpop.eup %311 }
  0x41   :  { %v127_v53 = vmul.f32 0.6931472, %v312_v51 }
  0x42   :  { %v314_v55 = vpop.eup %313 }
  0x43   :  { %v129_v9 = vmul.f32 0.6931472, %v314_v55  ;;  %v134_v59 = vadd.f32 %v127_v53, %v418_v35 }
  0x45   :  { %v316_v63 = vpop.eup %315  ;;  %v135_v5 = vadd.f32 %v129_v9, %v420_v39  ;;  %v170_v14 = vmul.f32 %v145_v56, %v134_v59 }
  0x46   :  { %v318_v12 = vpop.eup %317  ;;  %v131_v11 = vmul.f32 0.6931472, %v316_v63 }
  0x47   :  { %v133_v18 = vmul.f32 0.6931472, %v318_v12  ;;  %v171_v19 = vmul.f32 %v153_v60, %v135_v5  ;;  %v214_v39 = vsub.f32 %v170_v14, %v189_v15 }
  0x48   :  { %v136_v35 = vadd.f32 %v131_v11, %v426_v43 }
  0x49   :  { %v137_v25 = vadd.f32 %v133_v18, %v428_v44  ;;  %v215_v24 = vsub.f32 %v171_v19, %v197_v20  ;;  %v252_v44 = vsub.s32 0, %v228_v29 }
  0x4a   :  { %v172_v27 = vmul.f32 %v161_v7, %v136_v35 }
  0x4b   :  { %v173_v28 = vmul.f32 %v169_v13, %v137_v25 }
  0x4c   :  { %v216_v30 = vsub.f32 %v172_v27, %v205_v23 }
  0x4d   :  { %v217_v31 = vsub.f32 %v173_v28, %v213_v26 }
  0x4e   :  { %v219_v32 = vadd.f32 %v216_v30, %v214_v39 }
  0x4f   :  { %v220_v34 = vadd.f32 %v217_v31, %v215_v24 }
  0x51   :  { %v223_v36 = vcombine.low %v219_v32, %v220_v34 }
  0x53   :  { %v230_v17 = vrot.slane %v223_v36, %v229_v1 }
  0x55   :  { %v237_v43 = vrot.slane %v230_v17, %v229_v1 }
  0x57   :  { %v239_v3 = vadd.f32 %v237_v43, %v218_v33 }
  0x59   :  { %244 = vst.msk [vmem:[#allocation2] sm:$0x3] %vm382_vm1, %v239_v3 }
  0x60   :  { %v248_v38 = vld [vmem:[#allocation2] sm:$0x3] }
  0x61   :  { %v253_v40 = vrot.slane %v248_v38, %v252_v44  ;;  %v257_v41 = vrot.slane %v248_v38, %v256_v37 }
  0x63   :  { %v261_v0 = vsel %vm260_vm2, %v253_v40, 0.0  ;;  %v262_v42 = vsel %vm260_vm2, %v257_v41, 0.0 }
  0x64   :  { %v263_v2 = vadd.f32 %v262_v42, %v261_v0 }
  0x66   :  { %264 = vadd.xlane.f32.xlu0 %v263_v2 }
  0xef   :  { %v265_v45 = vpop.xlane.xlu0 %264 }
  0xf0   :  { %v266_v46 = vrot.slane %v265_v45, 4 }
  0xf2   :  { %v267_v47 = vadd.f32 %v266_v46, %v265_v45 }
  0xf4   :  { %v268_v48 = vrot.slane %v267_v47, 2 }
  0xf6   :  { %v269_v4 = vadd.f32 %v268_v48, %v267_v47 }
  0xf8   :  { %v270_v49 = vrot.slane %v269_v4, 1 }
  0xfa   :  { %v271_v50 = vadd.f32 %v270_v49, %v269_v4 }
  0xfc   :  { %290 = vpush %v271_v50 }
 0x12d   :  { %s291_s13 = spop %290 }
 0x12e   :  { %v273_v6 = vstv %s291_s13 }
 0x12f   :  { %275 = vst.msk [vmem:[#allocation3] sm:$0x1] %vm274_vm3, %v273_v6 }
 0x130   :  { %330 = shalt.err (!%p327_p4)
}
 0x131   :  { %285 = dma.vmem_to_hbm [thread:$0]  %s283_s12, 16, %s498_s2, [#allocation4]  }
 0x132   :  { %339 = dma.done.wait [#allocation4], 16  }
 0x133   :  { %340 = vsyncadd [#allocation4], 4294967280 }
 0x134   :  { %289 = vsyncpa [#allocation4], 1 }

</bundles_post_ra>
